<compile_context>
chip_gen: v7x
topology: tpu7x:2x2x1
jax: 0.10.0
libtpu: 0.0.40
codegen_flags: <defaults>
</compile_context>

<pallas_src>
import jax
import jax.numpy as jnp
import numpy as np
from jax.experimental import pallas as pl
from jax.experimental.pallas import tpu as pltpu


def _round_up(x, m):
    return (x + m - 1) // m * m


def _conv_kernel(x_ref, w_ref, o_ref):
    # x_ref: (1, KP, MP)   packed [im2col | ones | zero-pad] rows, pixels on lanes
    # w_ref: (OCP, KP)     packed [weights | bias | zero-pad] columns
    # o_ref: (1, OCP, MP)  conv output (bias already folded into the matmul)
    o_ref[0] = jnp.dot(
        w_ref[...], x_ref[0],
        preferred_element_type=jnp.float32,
        precision=jax.lax.Precision.HIGHEST,
    ).astype(o_ref.dtype)


def net_forward(x, weight, bias):
    """Conv2d(C->OC, KHxKW, stride 1, VALID, bias). x: (N,C,H,W) f32 -> (N,OC,OH,OW)."""
    N, C, H, W = x.shape
    OC, IC, KH, KW = weight.shape
    assert C == IC
    OH, OW = H - KH + 1, W - KW + 1

    M = OH * OW                        # valid output pixels only
    K = C * KH * KW + 1                # +1 ones-row carries the bias through the matmul
    MP = max(_round_up(M, 128), 128)   # lane-dense pixels (full vst, no vst.msk)
    KP = _round_up(K, 8)               # sublane-aligned contraction depth
    OCP = _round_up(OC, 8)             # sublane-aligned output channels

    # --- wrapper-side im2col (tiny; layout plumbing done once in XLA) --------
    # patches[n, c*KH*KW + i*KW + j, oh*OW + ow] = x[n, c, oh+i, ow+j]
    patches = jnp.stack(
        [x[:, :, i:i + OH, j:j + OW] for i in range(KH) for j in range(KW)],
        axis=2,
    ).reshape(N, C * KH * KW, M)
    x_col = jnp.concatenate([patches, jnp.ones((N, 1, M), x.dtype)], axis=1)
    x_col = jnp.pad(x_col, ((0, 0), (0, KP - K), (0, MP - M)))

    # Weights flattened in the same (c, kh, kw) order, bias appended as last column.
    w_flat = jnp.concatenate(
        [weight.reshape(OC, C * KH * KW), bias.reshape(OC, 1)], axis=1)
    w_packed = jnp.pad(w_flat, ((0, OCP - OC), (0, KP - K)))

    y = pl.pallas_call(
        _conv_kernel,
        out_shape=jax.ShapeDtypeStruct((N, OCP, MP), jnp.float32),
        grid=(N,),
        in_specs=[
            pl.BlockSpec((1, KP, MP), lambda n: (n, 0, 0)),
            pl.BlockSpec((OCP, KP), lambda n: (0, 0)),
        ],
        out_specs=pl.BlockSpec((1, OCP, MP), lambda n: (n, 0, 0)),
        compiler_params=pltpu.CompilerParams(
            dimension_semantics=("parallel",)),   # v7x: one image per TensorCore
        cost_estimate=pl.CostEstimate(
            flops=2 * N * OCP * KP * MP,
            transcendentals=0,
            bytes_accessed=4 * (N * KP * MP + OCP * KP + N * OCP * MP)),
    )(x_col, w_packed)

    # (N, OCP, MP) -> (N, OC, OH, OW): channels already on sublanes => NCHW slice,
    # no transpose needed.
    return y[:, :OC, :M].reshape(N, OC, OH, OW)


if __name__ == "__main__":
    key = jax.random.PRNGKey(0)
    kx, kw_, kb = jax.random.split(key, 3)

    N, C, H, W = 2, 4, 16, 16
    OC, KH, KW = 4, 3, 3

    x = jax.random.normal(kx, (N, C, H, W), dtype=jnp.float32)
    # PyTorch-like uniform init scale: 1/sqrt(fan_in)
    fan_in = C * KH * KW
    bound = 1.0 / np.sqrt(fan_in)
    weight = jax.random.uniform(kw_, (OC, C, KH, KW), jnp.float32, -bound, bound)
    bias = jax.random.uniform(kb, (OC,), jnp.float32, -bound, bound)

    fwd = jax.jit(net_forward)
    out = jax.block_until_ready(fwd(x, weight, bias))

    # Reference: XLA conv with torch Conv2d semantics (NCHW, OIHW, VALID).
    ref = jax.lax.conv_general_dilated(
        x, weight, window_strides=(1, 1), padding="VALID",
        dimension_numbers=("NCHW", "OIHW", "NCHW"),
        precision=jax.lax.Precision.HIGHEST,
    ) + bias.reshape(1, OC, 1, 1)
    np.testing.assert_allclose(np.asarray(out), np.asarray(ref),
                               rtol=1e-5, atol=1e-5)

    assert out.shape == (N, OC, H - KH + 1, W - KW + 1)
    print("KERNEL_OK")
</pallas_src>

<mosaic_0001>
module attributes {stable_mosaic.version = 11 : i64} {
  func.func @_conv_kernel(%arg0: i32, %arg1: memref<1x40x256xf32, #tpu.memory_space<vmem>>, %arg2: memref<8x40xf32, #tpu.memory_space<vmem>>, %arg3: memref<1x8x256xf32, #tpu.memory_space<vmem>>) attributes {dimension_semantics = [#tpu.dimension_semantics<parallel>], iteration_bounds = array<i64: 2>, scalar_prefetch = 0 : i64, scratch_operands = 0 : i64, tpu.core_type = #tpu.core_type<tc>, window_params = [{transform_indices = @transform_0, window_bounds = array<i64: 1, 40, 256>}, {pipeline_mode = #tpu.pipeline_mode<synchronous>, transform_indices = @transform_1, window_bounds = array<i64: 8, 40>}, {transform_indices = @transform_2, window_bounds = array<i64: 1, 8, 256>}]} {
    %c0 = arith.constant 0 : index
    %c0_0 = arith.constant 0 : index
    %0 = vector.load %arg2[%c0, %c0_0] : memref<8x40xf32, #tpu.memory_space<vmem>>, vector<8x40xf32>
    %c0_1 = arith.constant 0 : index
    %c0_2 = arith.constant 0 : index
    %c0_3 = arith.constant 0 : index
    %1 = vector.load %arg1[%c0_1, %c0_2, %c0_3] : memref<1x40x256xf32, #tpu.memory_space<vmem>>, vector<1x40x256xf32>
    %2 = vector.shape_cast %1 : vector<1x40x256xf32> to vector<40x256xf32>
    %cst = arith.constant dense<0.000000e+00> : vector<8x256xf32>
    %3 = tpu.matmul %0, %2, %cst {dimension_numbers = #tpu.dot_dimension_numbers<[1], [0], [0], [1], [0, 0, 1, 1], [], []>, precision = #tpu.contract_precision<fp32>} : vector<8x40xf32>, vector<40x256xf32>, vector<8x256xf32> -> vector<8x256xf32>
    %c0_4 = arith.constant 0 : index
    %c0_5 = arith.constant 0 : index
    %c0_6 = arith.constant 0 : index
    %4 = vector.load %arg3[%c0_4, %c0_5, %c0_6] : memref<1x8x256xf32, #tpu.memory_space<vmem>>, vector<1x8x256xf32>
    %5 = vector.shape_cast %4 : vector<1x8x256xf32> to vector<8x256xf32>
    %6 = vector.shape_cast %3 : vector<8x256xf32> to vector<1x8x256xf32>
    tpu.vector_store %arg3[%c0_4, %c0_5, %c0_6], %6 {strides = array<i32>} : memref<1x8x256xf32, #tpu.memory_space<vmem>>, vector<1x8x256xf32>,
    return
  }
  func.func @transform_0(%arg0: i32) -> (i32, i32, i32) {
    %c0_i32 = arith.constant 0 : i32
    %c0_i32_0 = arith.constant 0 : i32
    %c0_i32_1 = arith.constant 0 : i32
    return %arg0, %c0_i32, %c0_i32_0 : i32, i32, i32
  }
  func.func @transform_1(%arg0: i32) -> (i32, i32) {
    %c0_i32 = arith.constant 0 : i32
    %c0_i32_0 = arith.constant 0 : i32
    %c0_i32_1 = arith.constant 0 : i32
    return %c0_i32, %c0_i32_0 : i32, i32
  }
  func.func @transform_2(%arg0: i32) -> (i32, i32, i32) {
    %c0_i32 = arith.constant 0 : i32
    %c0_i32_0 = arith.constant 0 : i32
    %c0_i32_1 = arith.constant 0 : i32
    return %arg0, %c0_i32, %c0_i32_0 : i32, i32, i32
  }
}

</mosaic_0001>

<bundles_post_ra>
// kernel: net_forward.1
= control target key start
LH: loop header
LB: loop body
LE: loop exit
PB: predicated region body
PF: predicated region fallthrough
CT: control target
= control target key end

     0   :  { %s888_s9 = smov 0   ;;  %s1010_s0 = inlined_call_operand.vmem [shape: f32[2,40,256], index: 0, kind: input, shape index: {}]   ;;  %s1011_s1 = inlined_call_operand.vmem [shape: f32[8,40], index: 1, kind: input, shape index: {}]   ;;  %s1012_s2 = inlined_call_operand.vmem [shape: f32[2,8,256], index: 2, kind: output, shape index: {}]  }
   0x1 LB: > { %s785_s10 = sadd.s32 4294967295, %s870_s9   ;;  %p789_p0 = scmp.ge.s32.totalorder %s870_s9, 1  ;;  %s870_s9 = sphi %s888_s9, %s12_s9  }
   0x2   : > { %p112_p1 = scmp.lt.s32.totalorder %s870_s9, 3 }
   0x4   : > { %p113_p2 = pnand %p789_p0, %p112_p1 }
   0x5   : > { %p134_p3 = scmp.lt.s32.totalorder (!%p113_p2), %s785_s10, 1  ;;  %v144_v0 = vld [vmem:[%s1011_s1] sm:$0xff] (!%p113_p2)  ;;  %vm155_vm0 = vcmask (!%p113_p2), 326656   ;;  %v872_v1 = vmov (!%p113_p2), 0.0  }
   0x6   : > { %116 = sbr.rel (%p113_p2) target bundleno = 270 (0x10e), region = 28  ;;  %233 = vmatprep.mubr.f32.mxu1 (!%p113_p2), %v872_v1  ;;  %534 = vmatprep.mubr.f32.mxu0 (!%p113_p2), %v872_v1  ;;  %v157_v2 = vsel (!%p113_p2), %vm155_vm0, %v144_v0, 0 }
   0x7   : > { %v903_v3 = vand.u32 (!%p113_p2), 4294901760, %v157_v2 }
   0x9   : > { %v907_v4 = vsub.f32 (!%p113_p2), %v157_v2, %v903_v3 }
   0xb   : > { %v236_v8 = vand.u32 (!%p113_p2), 4294901760, %v907_v4 }
   0xd   : > { %s1014_s10 = smov (!%p134_p3, %s785_s10), 1  ;;  %v237_v29 = vsub.f32 %v907_v4, %v236_v8 }
   0xe   : > { %s854_s13 = smul.u32 80, %s1014_s10  ;;  %s795_s17 = sshll.u32 %s1014_s10, 4 }
   0xf   : > { %v238_v45 = vand.u32 4294901760, %v237_v29  ;;  %s143_s20 = scalar_lea.vmem %s1012_s2, %s795_s17 }
  0x10   : > { %s138_s16 = scalar_lea.vmem %s1010_s0, %s854_s13 }
  0x11   : > { %v146_v5 = vld [vmem:[%s138_s16 + $0x8] sm:$0xff]  ;;  %v148_v6 = vld [vmem:[%s138_s16 + $0x18] sm:$0xff]  ;;  %v145_v7 = vld [vmem:[%s138_s16] sm:$0xff] }
  0x12   : > { %v159_v9 = vand.u32 4294901760, %v146_v5  ;;  %v163_v10 = vand.u32 4294901760, %v148_v6  ;;  %v147_v11 = vld [vmem:[%s138_s16 + $0x10] sm:$0xff]  ;;  %v161_v12 = vand.u32 4294901760, %v145_v7  ;;  %v150_v13 = vld [vmem:[%s138_s16 + $0x28] sm:$0xff]  ;;  %v152_v14 = vld [vmem:[%s138_s16 + $0x38] sm:$0xff] }
  0x13   : > { %v165_v15 = vand.u32 4294901760, %v147_v11  ;;  %v167_v16 = vand.u32 4294901760, %v150_v13  ;;  %v171_v17 = vand.u32 4294901760, %v152_v14  ;;  %v149_v18 = vld [vmem:[%s138_s16 + $0x20] sm:$0xff]  ;;  %v151_v19 = vld [vmem:[%s138_s16 + $0x30] sm:$0xff]  ;;  %v154_v24 = vld [vmem:[%s138_s16 + $0x48] sm:$0xff] }
  0x14   : > { %v913_v20 = vpack.c.bf16 %v163_v10, %v159_v9  ;;  %v915_v21 = vsub.f32 %v146_v5, %v159_v9  ;;  %v917_v22 = vsub.f32 %v148_v6, %v163_v10  ;;  %v919_v23 = vsub.f32 %v145_v7, %v161_v12  ;;  %v153_v25 = vld [vmem:[%s138_s16 + $0x40] sm:$0xff] }
  0x15   : > { %v921_v26 = vpack.c.bf16 %v165_v15, %v161_v12  ;;  %v923_v27 = vsub.f32 %v147_v11, %v165_v15  ;;  %v925_v28 = vpack.c.bf16 %v171_v17, %v167_v16  ;;  %v932_v30 = vsub.f32 %v150_v13, %v167_v16 }
  0x16   : > { %797 = vmatprep.subr.bf16.mxu1 %v913_v20  ;;  %821 = vmatprep.subr.bf16.mxu0 %v913_v20  ;;  %v934_v31 = vsub.f32 %v152_v14, %v171_v17  ;;  %v169_v32 = vand.u32 4294901760, %v149_v18  ;;  %v173_v33 = vand.u32 4294901760, %v151_v19  ;;  %v938_v34 = vand.u32 4294901760, %v154_v24 }
  0x17   : > { %799 = vmatpush1.bf16.msra.mxu1 %v921_v26  ;;  %823 = vmatpush1.bf16.msra.mxu0 %v921_v26  ;;  %v940_v35 = vand.u32 4294901760, %v153_v25  ;;  %v247_v36 = vand.u32 4294901760, %v915_v21  ;;  %v259_v37 = vand.u32 4294901760, %v917_v22  ;;  %v253_v41 = vand.u32 4294901760, %v919_v23 }
  0x18   : > { %801 = vmatprep.subr.bf16.mxu1 %v925_v28  ;;  %825 = vmatprep.subr.bf16.mxu0 %v925_v28  ;;  %v946_v38 = vpack.c.bf16 %v173_v33, %v169_v32  ;;  %v948_v39 = vsub.f32 %v149_v18, %v169_v32  ;;  %v950_v40 = vsub.f32 %v151_v19, %v173_v33  ;;  %v265_v47 = vand.u32 4294901760, %v923_v27 }
  0x19   : > { %v954_v42 = vsub.f32 %v153_v25, %v940_v35  ;;  %v248_v43 = vsub.f32 %v915_v21, %v247_v36  ;;  %v260_v44 = vsub.f32 %v917_v22, %v259_v37  ;;  %v254_v46 = vsub.f32 %v919_v23, %v253_v41 }
  0x1a   : > { %v271_v48 = vand.u32 4294901760, %v932_v30  ;;  %v283_v49 = vand.u32 4294901760, %v934_v31  ;;  %v277_v52 = vand.u32 4294901760, %v948_v39  ;;  %v289_v53 = vand.u32 4294901760, %v950_v40 }
  0x1b   : > { %803 = vmatpush1.bf16.msra.mxu1 %v946_v38  ;;  %827 = vmatpush1.bf16.msra.mxu0 %v946_v38  ;;  %v249_v50 = vand.u32 4294901760, %v248_v43  ;;  %v261_v51 = vand.u32 4294901760, %v260_v44  ;;  %v828_v54 = vpack.c.bf16 %v259_v37, %v247_v36  ;;  %v255_v55 = vand.u32 4294901760, %v254_v46 }
  0x1c   : > { %176 = vmatprep.subr.mxu1 %v938_v34  ;;  %477 = vmatprep.subr.mxu0 %v938_v34  ;;  %v266_v56 = vsub.f32 %v923_v27, %v265_v47  ;;  %v272_v57 = vsub.f32 %v932_v30, %v271_v48  ;;  %v830_v59 = vpack.c.bf16 %v265_v47, %v253_v41  ;;  %v301_v9 = vand.u32 4294901760, %v954_v42 }
  0x1d   : > { %v804_v58 = vpack.c.bf16 %v261_v51, %v249_v50  ;;  %v284_v60 = vsub.f32 %v934_v31, %v283_v49  ;;  %v278_v61 = vsub.f32 %v948_v39, %v277_v52  ;;  %v832_v0 = vpack.c.bf16 %v283_v49, %v271_v48 }
  0x1e   : > { %v267_v62 = vand.u32 4294901760, %v266_v56  ;;  %v273_v63 = vand.u32 4294901760, %v272_v57  ;;  %v290_v2 = vsub.f32 %v950_v40, %v289_v53  ;;  %v294_v7 = vsub.f32 %v154_v24, %v938_v34 }
  0x1f   : > { %178 = vmatpush1.msra.mxu1 %v940_v35  ;;  %479 = vmatpush1.msra.mxu0 %v940_v35  ;;  %v285_v5 = vand.u32 4294901760, %v284_v60  ;;  %v279_v6 = vand.u32 4294901760, %v278_v61  ;;  %v834_v15 = vpack.c.bf16 %v289_v53, %v277_v52  ;;  %v302_v16 = vsub.f32 %v954_v42, %v301_v9 }
  0x20   : > { %805 = vmatprep.subr.bf16.mxu1 %v804_v58  ;;  %829 = vmatprep.subr.bf16.mxu0 %v828_v54  ;;  %v806_v10 = vpack.c.bf16 %v267_v62, %v255_v55  ;;  %v291_v11 = vand.u32 4294901760, %v290_v2  ;;  %v295_v13 = vand.u32 4294901760, %v294_v7  ;;  %v814_v24 = vpack.c.bf16 %v923_v27, %v919_v23 }
  0x21   : > { %239 = vmatmul.mubr.f32.vlgmr.msra.gmra.mrb[0].mxu1 %v238_v45  ;;  %538 = vmatmul.mubr.f32.vlgmr.msra.gmra.mrb[0].mxu0 %v236_v8  ;;  %v808_v12 = vpack.c.bf16 %v285_v5, %v273_v63  ;;  %v303_v19 = vand.u32 4294901760, %v302_v16  ;;  %v812_v8 = vpack.c.bf16 %v917_v22, %v915_v21  ;;  %v816_v25 = vpack.c.bf16 %v934_v31, %v932_v30 }
  0x22   : > { %807 = vmatpush1.bf16.msra.mxu1 %v806_v10  ;;  %831 = vmatpush1.bf16.msra.mxu0 %v830_v59  ;;  %v810_v14 = vpack.c.bf16 %v291_v11, %v279_v6  ;;  %v296_v17 = vsub.f32 %v294_v7, %v295_v13  ;;  %v818_v21 = vpack.c.bf16 %v950_v40, %v948_v39 }
  0x23   : > { %809 = vmatprep.subr.bf16.mxu1 %v808_v12  ;;  %833 = vmatprep.subr.bf16.mxu0 %v832_v0 }
  0x24   : > { %359 = vmatprep.mubr.f32.mxu1 %v872_v1  ;;  %638 = vmatprep.mubr.f32.mxu0 %v872_v1  ;;  %v297_v18 = vand.u32 4294901760, %v296_v17 }
  0x26   : > { %811 = vmatpush1.bf16.msra.mxu1 %v810_v14  ;;  %835 = vmatpush1.bf16.msra.mxu0 %v834_v15 }
  0x27   : > { %298 = vmatprep.subr.mxu1 %v297_v18  ;;  %579 = vmatprep.subr.mxu0 %v295_v13 }
  0x2a   : > { %304 = vmatpush1.msra.mxu1 %v303_v19  ;;  %583 = vmatpush1.msra.mxu0 %v301_v9 }
  0x2b   : > { %813 = vmatprep.subr.bf16.mxu1 %v812_v8  ;;  %837 = vmatprep.subr.bf16.mxu0 %v913_v20 }
  0x2c   : > { %361 = vmatmul.mubr.f32.vlgmr.msra.gmra.mrb[0].mxu1 %v903_v3  ;;  %640 = vmatmul.mubr.f32.vlgmr.msra.gmra.mrb[0].mxu0 %v903_v3 }
  0x2d   : > { %815 = vmatpush1.bf16.msra.mxu1 %v814_v24  ;;  %839 = vmatpush1.bf16.msra.mxu0 %v921_v26 }
  0x2e   : > { %817 = vmatprep.subr.bf16.mxu1 %v816_v25  ;;  %841 = vmatprep.subr.bf16.mxu0 %v925_v28 }
  0x2f   : > { %451 = vmatprep.mubr.f32.mxu1 %v872_v1  ;;  %720 = vmatprep.mubr.f32.mxu0 %v872_v1 }
  0x31   : > { %819 = vmatpush1.bf16.msra.mxu1 %v818_v21  ;;  %843 = vmatpush1.bf16.msra.mxu0 %v946_v38 }
  0x32   : > { %393 = vmatprep.subr.mxu1 %v294_v7  ;;  %663 = vmatprep.subr.mxu0 %v938_v34 }
  0x35   : > { %396 = vmatpush1.msra.mxu1 %v954_v42  ;;  %665 = vmatpush1.msra.mxu0 %v940_v35 }
  0x36   : > { %454 = vmatmul.mubr.f32.vlgmr.msra.gmra.mrb[0].mxu1 %v907_v4  ;;  %722 = vmatmul.mubr.f32.vlgmr.msra.gmra.mrb[0].mxu0 %v903_v3 }
 0x109   : > { %v455_v20 = vpop.f32.mrb[0].mxu1  ;;  %v723_v1 = vpop.f32.mrb[0].mxu0 }
 0x10a   : > { %v844_v22 = vadd.f32 %v723_v1, %v455_v20  ;;  %v457_v23 = vpop.f32.mrb[1].mxu1  ;;  %v725_v26 = vpop.f32.mrb[1].mxu0 }
 0x10b   : > { %v845_v27 = vadd.f32 %v725_v26, %v457_v23 }
 0x10c   : > { %728 = vst [vmem:[%s143_s20] sm:$0xff] %v844_v22 }
 0x10d   : > { %729 = vst [vmem:[%s143_s20 + $0x8] sm:$0xff] %v845_v27 }
 0x10e PF: > { %s12_s9 = sadd.s32 1, %s870_s9  }
 0x10f   : > { %p9_p4 = scmp.ge.s32.totalorder %s12_s9, 4  }
 0x111   :  { %11 = sbr.rel (!%p9_p4) target bundleno = 1 (0x1), region = 58 }

</bundles_post_ra>
